<compile_context>
chip_gen: v7x
topology: tpu7x:2x2x1
jax: 0.10.0
libtpu: 0.0.40
codegen_flags: <defaults>
</compile_context>

<pallas_src>
import jax
import jax.numpy as jnp
from jax.experimental import pallas as pl
from jax.experimental.pallas import tpu as pltpu


def neural_lm_kernel(x_ref, w1_ref, b1_ref, w2_ref, b2_ref, out_ref, h_ref):
    """One (batch-tile i, vocab-tile j) grid step.

    x_ref : (TB, C*E) bf16    w1_ref: (C*E, H) bf16   b1_ref: (1, H)  f32
    w2_ref: (H, TV)   bf16    b2_ref: (1, TV)  f32    out_ref: (TB, TV) f32
    h_ref : (TB, H) bf16 VMEM scratch -- hidden activations, computed once per
            batch tile i and reused across all vocab tiles j (j is inner axis).
    """
    j = pl.program_id(1)

    @pl.when(j == 0)
    def _():
        # l1: bf16 MXU operands, f32 accumulation; bias + tanh stay in f32
        # (v5e VPU/EUP have no native bf16 elementwise path).
        h = jnp.dot(x_ref[...], w1_ref[...], preferred_element_type=jnp.float32)
        h = jnp.tanh(h + b1_ref[...])
        # TODO(synk): nn.Dropout is identity in eval mode; training-mode masking omitted.
        h_ref[...] = h.astype(h_ref.dtype)

    # l2: (TB, H) @ (H, TV) -> lane-dense (TB, TV) logits tile.
    logits = jnp.dot(h_ref[...], w2_ref[...], preferred_element_type=jnp.float32)
    out_ref[...] = (logits + b2_ref[...]).astype(out_ref.dtype)


def neural_lm_forward(token_ids, embeddings, w1, b1, w2, b2, *, tb=128, tv=256):
    """token_ids: (C, B) int32; embeddings: (V, E) f32; w1: (C*E, H); w2: (H, V)."""
    C, B = token_ids.shape
    E = embeddings.shape[1]
    K1 = C * E
    H = w1.shape[1]
    V = w2.shape[1]
    assert B % tb == 0 and V % tv == 0 and K1 % 128 == 0 and H % 128 == 0

    # Glue: frozen-embedding lookup + the PyTorch `.view(inp.size(1), -1)` reshape.
    # TODO(synk): fuse this gather into the kernel (scalar-prefetch / DMA gather) to
    # avoid one HBM round-trip of the (B, C*E) activations.
    flat = embeddings[token_ids].reshape(B, K1)

    # bf16 MXU operands; accumulation stays f32 inside the kernel.
    x_bf = flat.astype(jnp.bfloat16)
    w1_bf = w1.astype(jnp.bfloat16)
    w2_bf = w2.astype(jnp.bfloat16)

    cost = pl.CostEstimate(
        flops=2 * B * K1 * H + 2 * B * H * V,
        transcendentals=B * H,
        bytes_accessed=(B * K1 + K1 * H + H * V) * 2 + (H + V) * 4 + B * V * 4,
    )

    return pl.pallas_call(
        neural_lm_kernel,
        out_shape=jax.ShapeDtypeStruct((B, V), jnp.float32),
        grid_spec=pltpu.PrefetchScalarGridSpec(
            num_scalar_prefetch=0,
            grid=(B // tb, V // tv),          # i: batch tiles, j: vocab tiles (inner)
            in_specs=[
                pl.BlockSpec((tb, K1), lambda i, j: (i, 0)),   # x
                pl.BlockSpec((K1, H), lambda i, j: (0, 0)),    # w1 (resident)
                pl.BlockSpec((1, H), lambda i, j: (0, 0)),     # b1
                pl.BlockSpec((H, tv), lambda i, j: (0, j)),    # w2 vocab tile
                pl.BlockSpec((1, tv), lambda i, j: (0, j)),    # b2 vocab tile
            ],
            out_specs=pl.BlockSpec((tb, tv), lambda i, j: (i, j)),
            scratch_shapes=[pltpu.VMEM((tb, H), jnp.bfloat16)],
        ),
        compiler_params=pltpu.CompilerParams(
            dimension_semantics=("parallel", "arbitrary"),
            vmem_limit_bytes=32 * 1024 * 1024,   # fits v5e/v6e/v7x scoped VMEM
        ),
        cost_estimate=cost,
    )(x_bf, w1_bf, b1, w2_bf, b2)


def _reference(token_ids, embeddings, w1, b1, w2, b2):
    # Same math as the kernel (bf16 matmul operands, f32 accumulation / bias / tanh),
    # and the same PyTorch-faithful flat reshape of (C, B, E) into (B, C*E).
    C, B = token_ids.shape
    E = embeddings.shape[1]
    flat = embeddings[token_ids].reshape(B, C * E)
    h = jnp.tanh(
        jnp.dot(flat.astype(jnp.bfloat16), w1.astype(jnp.bfloat16),
                preferred_element_type=jnp.float32) + b1)
    return jnp.dot(h.astype(jnp.bfloat16), w2.astype(jnp.bfloat16),
                   preferred_element_type=jnp.float32) + b2


if __name__ == "__main__":
    # Small but MXU/lane-aligned sizes (128-multiples) so the kernel exercises the
    # real tiling path: grid = (B//128, V//256) = (2, 2).
    vocab_size = 512
    emb_dim = 32
    context_size = 4          # C*E = 128  (MXU-aligned contraction)
    hidden_size = 128         # lane-aligned hidden width
    batch = 256
    dropout_rate = 0.1        # unused at eval

    key = jax.random.PRNGKey(0)
    k_emb, k_w1, k_b1, k_w2, k_b2, k_ids = jax.random.split(key, 6)

    # Deterministic "pretrained" embeddings (frozen) and linear-layer params.
    pretrained_embeddings = jax.random.normal(k_emb, (vocab_size, emb_dim), jnp.float32) * 0.1
    # nn.Linear stores weight as (out, in); we pre-transpose to (in, out) for the kernel.
    w1 = jax.random.normal(k_w1, (context_size * emb_dim, hidden_size), jnp.float32) * 0.05
    b1 = jax.random.normal(k_b1, (1, hidden_size), jnp.float32) * 0.05
    w2 = jax.random.normal(k_w2, (hidden_size, vocab_size), jnp.float32) * 0.05
    b2 = jax.random.normal(k_b2, (1, vocab_size), jnp.float32) * 0.05

    # Input token ids, shape (context_size, batch) per the module's forward semantics.
    token_ids = jax.random.randint(k_ids, (context_size, batch), 0, vocab_size, jnp.int32)

    out = neural_lm_forward(token_ids, pretrained_embeddings, w1, b1, w2, b2)
    out = jax.block_until_ready(out)

    ref = _reference(token_ids, pretrained_embeddings, w1, b1, w2, b2)
    assert out.shape == (batch, vocab_size)
    err = float(jnp.max(jnp.abs(out - ref)))
    assert jnp.allclose(out, ref, atol=2e-3, rtol=2e-2), f"max abs err {err}"

    print("KERNEL_OK")
</pallas_src>

<mosaic_0001>
module attributes {stable_mosaic.version = 11 : i64} {
  func.func @neural_lm_kernel(%arg0: i32, %arg1: i32, %arg2: memref<128x128xbf16, #tpu.memory_space<vmem>>, %arg3: memref<128x128xbf16, #tpu.memory_space<vmem>>, %arg4: memref<1x128xf32, #tpu.memory_space<vmem>>, %arg5: memref<128x256xbf16, #tpu.memory_space<vmem>>, %arg6: memref<1x256xf32, #tpu.memory_space<vmem>>, %arg7: memref<128x256xf32, #tpu.memory_space<vmem>>, %arg8: memref<128x128xbf16, #tpu.memory_space<vmem>>) attributes {dimension_semantics = [#tpu.dimension_semantics<parallel>, #tpu.dimension_semantics<arbitrary>], iteration_bounds = array<i64: 2, 2>, scalar_prefetch = 0 : i64, scratch_operands = 1 : i64, tpu.core_type = #tpu.core_type<tc>, window_params = [{transform_indices = @transform_0, window_bounds = array<i64: 128, 128>}, {pipeline_mode = #tpu.pipeline_mode<synchronous>, transform_indices = @transform_1, window_bounds = array<i64: 128, 128>}, {pipeline_mode = #tpu.pipeline_mode<synchronous>, transform_indices = @transform_2, window_bounds = array<i64: 1, 128>}, {transform_indices = @transform_3, window_bounds = array<i64: 128, 256>}, {transform_indices = @transform_4, window_bounds = array<i64: 1, 256>}, {transform_indices = @transform_5, window_bounds = array<i64: 128, 256>}]} {
    %c0_i32 = arith.constant 0 : i32
    %0 = arith.cmpi eq, %arg1, %c0_i32 : i32
    %1 = arith.extui %0 : i1 to i32
    %c0_i32_0 = arith.constant 0 : i32
    %2 = arith.cmpi ne, %1, %c0_i32_0 : i32
    scf.if %2 {
      %c0_8 = arith.constant 0 : index
      %c0_9 = arith.constant 0 : index
      %10 = vector.load %arg2[%c0_8, %c0_9] : memref<128x128xbf16, #tpu.memory_space<vmem>>, vector<128x128xbf16>
      %c0_10 = arith.constant 0 : index
      %c0_11 = arith.constant 0 : index
      %11 = vector.load %arg3[%c0_10, %c0_11] : memref<128x128xbf16, #tpu.memory_space<vmem>>, vector<128x128xbf16>
      %cst_12 = arith.constant dense<0.000000e+00> : vector<128x128xf32>
      %12 = tpu.matmul %10, %11, %cst_12 {dimension_numbers = #tpu.dot_dimension_numbers<[1], [0], [0], [1], [0, 0, 1, 1], [], []>} : vector<128x128xbf16>, vector<128x128xbf16>, vector<128x128xf32> -> vector<128x128xf32>
      %c0_13 = arith.constant 0 : index
      %c0_14 = arith.constant 0 : index
      %13 = vector.load %arg4[%c0_13, %c0_14] : memref<1x128xf32, #tpu.memory_space<vmem>>, vector<1x128xf32>
      %14 = vector.broadcast %13 : vector<1x128xf32> to vector<128x128xf32>
      %15 = arith.addf %12, %14 : vector<128x128xf32>
      %16 = math.tanh %15 : vector<128x128xf32>
      %17 = arith.truncf %16 : vector<128x128xf32> to vector<128x128xbf16>
      %c0_15 = arith.constant 0 : index
      %c0_16 = arith.constant 0 : index
      %18 = vector.load %arg8[%c0_15, %c0_16] : memref<128x128xbf16, #tpu.memory_space<vmem>>, vector<128x128xbf16>
      tpu.vector_store %arg8[%c0_15, %c0_16], %17 {strides = array<i32>} : memref<128x128xbf16, #tpu.memory_space<vmem>>, vector<128x128xbf16>,
    } else {
    }
    %c0 = arith.constant 0 : index
    %c0_1 = arith.constant 0 : index
    %3 = vector.load %arg8[%c0, %c0_1] : memref<128x128xbf16, #tpu.memory_space<vmem>>, vector<128x128xbf16>
    %c0_2 = arith.constant 0 : index
    %c0_3 = arith.constant 0 : index
    %4 = vector.load %arg5[%c0_2, %c0_3] : memref<128x256xbf16, #tpu.memory_space<vmem>>, vector<128x256xbf16>
    %cst = arith.constant dense<0.000000e+00> : vector<128x256xf32>
    %5 = tpu.matmul %3, %4, %cst {dimension_numbers = #tpu.dot_dimension_numbers<[1], [0], [0], [1], [0, 0, 1, 1], [], []>} : vector<128x128xbf16>, vector<128x256xbf16>, vector<128x256xf32> -> vector<128x256xf32>
    %c0_4 = arith.constant 0 : index
    %c0_5 = arith.constant 0 : index
    %6 = vector.load %arg6[%c0_4, %c0_5] : memref<1x256xf32, #tpu.memory_space<vmem>>, vector<1x256xf32>
    %7 = vector.broadcast %6 : vector<1x256xf32> to vector<128x256xf32>
    %8 = arith.addf %5, %7 : vector<128x256xf32>
    %c0_6 = arith.constant 0 : index
    %c0_7 = arith.constant 0 : index
    %9 = vector.load %arg7[%c0_6, %c0_7] : memref<128x256xf32, #tpu.memory_space<vmem>>, vector<128x256xf32>
    tpu.vector_store %arg7[%c0_6, %c0_7], %8 {strides = array<i32>} : memref<128x256xf32, #tpu.memory_space<vmem>>, vector<128x256xf32>,
    return
  }
  func.func @transform_0(%arg0: i32, %arg1: i32) -> (i32, i32) {
    %c0_i32 = arith.constant 0 : i32
    %c0_i32_0 = arith.constant 0 : i32
    return %arg0, %c0_i32 : i32, i32
  }
  func.func @transform_1(%arg0: i32, %arg1: i32) -> (i32, i32) {
    %c0_i32 = arith.constant 0 : i32
    %c0_i32_0 = arith.constant 0 : i32
    %c0_i32_1 = arith.constant 0 : i32
    return %c0_i32, %c0_i32_0 : i32, i32
  }
  func.func @transform_2(%arg0: i32, %arg1: i32) -> (i32, i32) {
    %c0_i32 = arith.constant 0 : i32
    %c0_i32_0 = arith.constant 0 : i32
    %c0_i32_1 = arith.constant 0 : i32
    return %c0_i32, %c0_i32_0 : i32, i32
  }
  func.func @transform_3(%arg0: i32, %arg1: i32) -> (i32, i32) {
    %c0_i32 = arith.constant 0 : i32
    %c0_i32_0 = arith.constant 0 : i32
    return %c0_i32, %arg1 : i32, i32
  }
  func.func @transform_4(%arg0: i32, %arg1: i32) -> (i32, i32) {
    %c0_i32 = arith.constant 0 : i32
    %c0_i32_0 = arith.constant 0 : i32
    return %c0_i32, %arg1 : i32, i32
  }
  func.func @transform_5(%arg0: i32, %arg1: i32) -> (i32, i32) {
    %c0_i32 = arith.constant 0 : i32
    return %arg0, %arg1 : i32, i32
  }
}

</mosaic_0001>

<bundles_post_ra>
// kernel: tpu_custom_call.1
= control target key start
LH: loop header
LB: loop body
LE: loop exit
PB: predicated region body
PF: predicated region fallthrough
CT: control target
= control target key end

     0   :  { %s2173_s0 = inlined_call_operand.hbm [shape: bf16[256,128], index: 0, kind: input, shape index: {}]   ;;  %s2174_s1 = inlined_call_operand.hbm [shape: bf16[128,128], index: 1, kind: input, shape index: {}]   ;;  %s2175_s2 = inlined_call_operand.vmem [shape: f32[1,128], index: 2, kind: input, shape index: {}]   ;;  %s2176_s3 = inlined_call_operand.hbm [shape: bf16[128,512], index: 3, kind: input, shape index: {}]   ;;  %s2177_s4 = inlined_call_operand.vmem [shape: f32[1,512], index: 4, kind: input, shape index: {}]   ;;  %s2178_s5 = inlined_call_operand.hbm [shape: f32[256,512], index: 5, kind: output, shape index: {}]  }
   0x1   :  { %2197 = sst [smem:[#allocation25_spill]] %s2173_s0 }
   0x2   :  { %2198 = sst [smem:[#allocation26_spill]] %s2175_s2 }
   0x3   :  { %2199 = sst [smem:[#allocation27_spill]] %s2177_s4 }
   0x4   :  { %2200 = sst [smem:[#allocation28_spill]] %s2178_s5 }
   0x5   :  { %10 = vsyncpa [#allocation4], 0 }
   0x6   :  { %12 = vsyncpa [#allocation4 + $0x1], 0 }
   0x7   :  { %13 = vsyncpa [#allocation7], 0 }
   0x8   :  { %14 = vsyncpa [#allocation5], 0 }
   0x9   :  { %16 = vsyncpa [#allocation5 + $0x1], 0  ;;  %s1656_s18 = smov 0   ;;  %s1658_s19 = smov 0  }
   0xa   :  { %s1660_s20 = smov 0   ;;  %s1662_s21 = smov 0  }
   0xb   :  { %s1664_s22 = smov 0   ;;  %s1666_s23 = smov 0  }
   0xc   :  { %s1668_s24 = smov 0   ;;  %s1670_s25 = smov 0  }
   0xd   :  { %s1672_s26 = smov 0   ;;  %s1674_s27 = smov 0  }
   0xe   :  { %s1676_s28 = smov 0   ;;  %s1678_s29 = smov 0  }
   0xf   :  { %s1680_s30 = smov 0   ;;  %s1682_s6 = smov 0  }
  0x10 LB: > { %2201 = sst [smem:[#allocation14_spill]] %s1579_s23  ;;  %s31_s7 = sadd.s32 1, %s1603_s29  ;;  %s1611_s6 = sphi %s1682_s6, %s22_s6   ;;  %s1607_s30 = sphi %s1680_s30, %s2251_s30   ;;  %s1603_s29 = sphi %s1678_s29, %s2250_s29   ;;  %s1599_s28 = sphi %s1676_s28, %s2259_s28   ;;  %s1595_s27 = sphi %s1674_s27, %s2248_s27   ;;  %s1591_s26 = sphi %s1672_s26, %s2247_s26   ;;  %s1587_s25 = sphi %s1670_s25, %s2258_s25   ;;  %s1583_s24 = sphi %s1668_s24, %s2257_s24   ;;  %s1579_s23 = sphi %s1666_s23, %s2245_s23   ;;  %s1575_s22 = sphi %s1664_s22, %s2256_s22   ;;  %s1571_s21 = sphi %s1662_s21, %s2255_s21   ;;  %s1567_s20 = sphi %s1660_s20, %s2254_s20   ;;  %s1563_s19 = sphi %s1658_s19, %s2253_s19   ;;  %s1559_s18 = sphi %s1656_s18, %s2252_s18  }
  0x11   : > { %2202 = sst [smem:[#allocation15_spill]] %s1591_s26  ;;  %s34_s8 = sadd.s32 1, %s1607_s30 }
  0x12   : > { %2203 = sst [smem:[#allocation16_spill]] %s1595_s27  ;;  %p32_p0 = scmp.ge.s32.totalorder %s31_s7, 2 }
  0x13   : > { %2204 = sst [smem:[#allocation17_spill]] %s1599_s28  ;;  %s41_s9 = sadd.s32 1, %s1591_s26 }
  0x14   : > { %2205 = sst [smem:[#allocation18_spill]] %s1603_s29  ;;  %p48_p1 = scmp.ne.s32.totalorder %s1591_s26, %s1587_s25 }
  0x15   : > { %2206 = sst [smem:[#allocation19_spill]] %s1607_s30  ;;  %p2184_p2 = scmp.eq.s32.totalorder %s1611_s6, 0 }
  0x16   : > { %s2261_s7 = smov (%p32_p0, %s31_s7), 0  ;;  %s2263_s8 = smov (!%p32_p0, %s34_s8), %s1607_s30 }
  0x17   : > { %2207 = sst [smem:[#allocation20_spill]] %s2261_s7  ;;  %p1737_p3 = por %p2184_p2, %p48_p1 }
  0x18   : > { %s1743_s11 = ssub.s32 %s1603_s29, %s2261_s7  ;;  %p36_p4 = scmp.ge.s32.totalorder %s2263_s8, 2 }
  0x19   : > { %p107_p5 = scmp.eq.s32.totalorder %s1743_s11, 0  ;;  %s163_s12 = sadd.s32 1, %s1567_s20 }
  0x1a   : > { %s2265_s8 = smov (%p36_p4, %s2263_s8), 0  ;;  %p2183_p6 = scmp.lt.s32.totalorder %s1611_s6, 4 }
  0x1b   : > { %2209 = sst [smem:[#allocation21_spill]] %s2265_s8  ;;  %s38_s13 = ssub.s32 %s1607_s30, %s2265_s8 }
  0x1c   : > { %p39_p7 = scmp.eq.s32.totalorder %s38_s13, 0  ;;  %s160_s14 = sor.u32 %s1743_s11, %s38_s13 }
  0x1d   : > { %p161_p8 = scmp.eq.s32.totalorder %s160_s14, 0  ;;  %s216_s15 = sand.u32 1, %s1611_s6  }
  0x1e   : > { %s1755_s16 = scalar_select %p39_p7, %s1591_s26, %s41_s9  }
  0x1f   : > { %s1758_s17 = scalar_select %p161_p8, %s1567_s20, %s163_s12  }
  0x20   : > { %2210 = sst [smem:[#allocation22_spill]] %s1755_s16  ;;  %s218_s7 = sand.u32 1, %s1591_s26  }
  0x21   : > { %2211 = sst [smem:[#allocation23_spill]] %s1758_s17  ;;  %s1010_s5 = sshll.u32 %s218_s7, 6 }
  0x22   : > { %s1063_s28 = sshll.u32 %s1607_s30, 10  ;;  %s2212_s0 = sld [smem:[#allocation25_spill]] }
  0x23   : > { %s220_s8 = scalar_lea.vmem [#allocation3], %s1010_s5  ;;  %p1771_p9 = pnand %p2183_p6, %p1737_p3 }
  0x24   : > { %s227_s13 = sshll.u32 %s220_s8, 4  ;;  %s1777_s7 = scalar_lea.sflag [#allocation4], %s216_s15  ;;  %s1775_s13 = int_to_ptr.vmem [resolvable:$true] %s227_s13 }
  0x25   : > { %p1371_p11 = pneg %p1771_p9 }
  0x28   : > { %s1765_s27 = scalar_lea.hbm %s2212_s0, %s1063_s28  ;;  %s1374_s28 = scalar_lea.hbm %s2212_s0, 2048 }
  0x29   : > { %s1369_s2 = scalar_lea.hbm %s1765_s27, 1024  ;;  %p1375_p0 = scmp.lt.u32.totalorder %s1765_s27, %s2212_s0 }
  0x2a   : > { %p1370_p10 = scmp.ne.s32.totalorder %s1765_s27, %s1369_s2  ;;  %p1376_p1 = scmp.lt.u32.totalorder %s1374_s28, %s1369_s2 }
  0x2b   : > { %p1378_p4 = scmp.lt.u32.totalorder %s1369_s2, %s1765_s27 }
  0x2c   : > { %p1372_p12 = pnand %p1371_p11, %p1370_p10  ;;  %p1377_p3 = por %p1376_p1, %p1375_p0 }
  0x2e   : > { %p1373_p13 = pneg %p1372_p12  ;;  %p1379_p7 = por %p1378_p4, %p1377_p3 }
  0x30   : > { %p1380_p8 = pnand %p1379_p7, %p1373_p13 }
  0x32   : > { %1383 = shalt.err (!%p1380_p8)
}
  0x33   : > { %s1384_s12 = scalar_lea.vmem %s1775_s13, 1024  ;;  %s1613_s14 = smov [#allocation3]  }
  0x34   : > { %p1385_p10 = scmp.ne.s32.totalorder %s1775_s13, %s1384_s12  ;;  %s1389_s15 = sshll.u32 %s1613_s14, 4  ;;  %s1390_s15 = int_to_ptr.vmem [resolvable:$false] %s1389_s15 }
  0x35   : > { %s1391_s4 = scalar_lea.vmem %s1390_s15, 2048  ;;  %p1392_p2 = scmp.lt.s32.totalorder %s1775_s13, %s1390_s15 }
  0x36   : > { %p1387_p12 = pnand %p1385_p10, %p1371_p11  ;;  %p1393_p0 = scmp.lt.s32.totalorder %s1391_s4, %s1384_s12 }
  0x38   : > { %p1388_p6 = pneg %p1387_p12  ;;  %p1394_p1 = por %p1393_p0, %p1392_p2 }
  0x3a   : > { %p1395_p3 = pnand %p1394_p1, %p1388_p6 }
  0x3c   : > { %1398 = shalt.err (!%p1395_p3)
}
  0x3d   : > { %s2185_s2 = smov 64   ;;  %s2186_s5 = smov 4  }
  0x3e   : > { %1163 = dma.hbm_to_vmem [thread:$0]  (!%p1771_p9), %s1765_s27, 1024, %s1775_s13, %s1777_s7, %s2185_s2, %s2185_s2, %s2186_s5  }
  0x3f   : > { %s1809_s28 = sadd.s32 4294967295, %s1611_s6   ;;  %s1006_s8 = sadd.s32 4294967294, %s1611_s6  }
  0x40   : > { %p54_p2 = scmp.ne.s32.totalorder %s1587_s25, %s1583_s24  ;;  %p2191_p6 = scmp.eq.s32.totalorder %s1809_s28, 0 }
  0x41   : > { %s109_s10 = sadd.s32 1, %s1579_s23  ;;  %p116_p11 = scmp.ne.s32.totalorder %s1579_s23, %s1575_s22 }
  0x42   : > { %p1820_p13 = por %p2191_p6, %p54_p2  ;;  %p122_p4 = scmp.ne.s32.totalorder %s1575_s22, %s1571_s21 }
  0x43   : > { %s1829_s27 = scalar_select %p107_p5, %s1579_s23, %s109_s10  }
  0x44   : > { %s2214_s9 = scalar_select %p1820_p13, 1, 0 }
  0x45   : > { %2215 = sst [smem:[#allocation24_spill]] %s1829_s27  ;;  %p2216_p9 = scmp.eq.s32.totalorder %s1611_s6, 0 }
  0x46   : > { %p1839_p8 = por %p122_p4, %p2191_p6  ;;  %p173_p10 = scmp.ne.s32.totalorder %s1567_s20, %s1563_s19 }
  0x47   : > { %p1833_p7 = por %p116_p11, %p2216_p9  ;;  %p174_p12 = scmp.eq.s32.totalorder %s1809_s28, 3 }
  0x48   : > { %s2218_s24 = scalar_select %p1839_p8, 1, 0 }
  0x49   : > { %p179_p0 = scmp.ne.s32.totalorder %s1563_s19, %s1559_s18  ;;  %p180_p1 = scmp.eq.s32.totalorder %s1006_s8, 3 }
  0x4a   : > { %p1848_p5 = por %p174_p12, %p173_p10  ;;  %p1007_p3 = scmp.ge.s32.totalorder %s1611_s6, 1 }
  0x4b   : > { %p1853_p2 = por %p180_p1, %p179_p0  ;;  %p187_p11 = scmp.lt.s32.totalorder %s1611_s6, 5 }
  0x4c   : > { %s2219_s21 = scalar_select %p1848_p5, 1, 0 }
  0x4d   : > { %s2220_s11 = scalar_select %p1853_p2, 1, 0 }
  0x4e   : > { %p1858_p4 = pnand %p1007_p3, %p187_p11  ;;  %s1616_s14 = smov [#allocation6]  }
  0x4f   : > { %s199_s15 = sshll.u32 %s1616_s14, 4  ;;  %p2222_p9 = scmp.lt.s32.totalorder %s1611_s6, 4  ;;  %s1862_s15 = int_to_ptr.vmem [resolvable:$true] %s199_s15 }
  0x50   : > { %s2221_s12 = scalar_select %p1858_p4, 1, 0 }
  0x51   : > { %p1868_p10 = pnand %p2222_p9, %p1833_p7  ;;  %p1156_p12 = pneg %p1858_p4 }
  0x52   : > { %s239_s8 = sand.u32 1, %s1579_s23   ;;  %s1064_s5 = sshll.u32 %s1603_s29, 7 }
  0x53   : > { %s2223_s4 = scalar_select %p1868_p10, 1, 0 }
  0x54   : > { %s1013_s10 = sshll.u32 %s239_s8, 7  ;;  %p1877_p0 = pnand %p1156_p12, %p2191_p6 }
  0x55   : > { %s241_s14 = scalar_lea.vmem [#allocation8], %s1013_s10  ;;  %s1885_s16 = scalar_lea.hbm %s2176_s3, %s1064_s5 }
  0x56   : > { %s248_s0 = sshll.u32 %s241_s14, 4  ;;  %s1399_s17 = scalar_lea.hbm %s2174_s1, 1024  ;;  %s1911_s0 = int_to_ptr.vmem [resolvable:$true] %s248_s0 }
  0x57   : > { %p1400_p7 = scmp.ne.s32.totalorder %s2174_s1, %s1399_s17  ;;  %p1401_p1 = pneg %p1877_p0 }
  0x58   : > { %p1406_p9 = scmp.lt.u32.totalorder %s1399_s17, %s2174_s1 }
  0x59   : > { %p1402_p3 = pnand %p1401_p1, %p1400_p7 }
  0x5b   : > { %p1403_p11 = pneg %p1402_p3 }
  0x5d   : > { %p1408_p12 = pnand %p1406_p9, %p1403_p11 }
  0x5f   : > { %1411 = shalt.err (!%p1408_p12)
}
  0x60   : > { %s1412_s30 = scalar_lea.vmem %s1862_s15, 1024  ;;  %p1420_p8 = scmp.lt.s32.totalorder %s1862_s15, %s1862_s15 }
  0x61   : > { %p1413_p6 = scmp.ne.s32.totalorder %s1862_s15, %s1412_s30  ;;  %p1421_p13 = scmp.lt.s32.totalorder %s1412_s30, %s1412_s30 }
  0x63   : > { %p1415_p2 = pnand %p1413_p6, %p1401_p1  ;;  %p1422_p4 = por %p1421_p13, %p1420_p8 }
  0x65   : > { %p1416_p5 = pneg %p1415_p2 }
  0x67   : > { %p1423_p10 = pnand %p1422_p4, %p1416_p5 }
  0x69   : > { %1426 = shalt.err (!%p1423_p10)
}
  0x6a   : > { %s2225_s23 = smov 4   ;;  %s2226_s26 = smov 64  }
  0x6b   : > { %1159 = dma.hbm_to_vmem [thread:$0]  (!%p1877_p0), %s2174_s1, 1024, %s1862_s15, [#allocation7], %s2226_s26, %s2226_s26, %s2225_s23  }
  0x6c   : > { %s1427_s5 = scalar_lea.hbm %s1885_s16, 2048  ;;  %p2227_p13 = scmp.ne.s32.totalorder %s2223_s4, 0 }
  0x6d   : > { %p1428_p6 = scmp.ne.s32.totalorder %s1885_s16, %s1427_s5  ;;  %s1432_s14 = scalar_lea.hbm %s2176_s3, 4096 }
  0x6e   : > { %p1429_p8 = pneg %p2227_p13  ;;  %p1433_p4 = scmp.lt.u32.totalorder %s1885_s16, %s2176_s3 }
  0x6f   : > { %p1434_p10 = scmp.lt.u32.totalorder %s1432_s14, %s1427_s5  ;;  %p1436_p7 = scmp.lt.u32.totalorder %s1427_s5, %s1885_s16 }
  0x70   : > { %p1430_p5 = pnand %p1429_p8, %p1428_p6 }
  0x71   : > { %p1435_p0 = por %p1434_p10, %p1433_p4 }
  0x72   : > { %p1431_p2 = pneg %p1430_p5 }
  0x73   : > { %p1437_p1 = por %p1436_p7, %p1435_p0 }
  0x75   : > { %p1438_p3 = pnand %p1437_p1, %p1431_p2 }
  0x77   : > { %1441 = shalt.err (!%p1438_p3)
}
  0x78   : > { %s1442_s15 = scalar_lea.vmem %s1911_s0, 2048  ;;  %s1617_s10 = smov [#allocation8]  }
  0x79   : > { %p1443_p11 = scmp.ne.s32.totalorder %s1911_s0, %s1442_s15  ;;  %s1447_s30 = sshll.u32 %s1617_s10, 4  ;;  %s1448_s30 = int_to_ptr.vmem [resolvable:$false] %s1447_s30 }
  0x7a   : > { %s1449_s23 = scalar_lea.vmem %s1448_s30, 4096  ;;  %p1450_p6 = scmp.lt.s32.totalorder %s1911_s0, %s1448_s30 }
  0x7b   : > { %p1445_p9 = pnand %p1443_p11, %p1429_p8  ;;  %p1451_p5 = scmp.lt.s32.totalorder %s1449_s23, %s1442_s15 }
  0x7d   : > { %p1446_p12 = pneg %p1445_p9  ;;  %p1452_p4 = por %p1451_p5, %p1450_p6 }
  0x7f   : > { %p1453_p10 = pnand %p1452_p4, %p1446_p12 }
  0x81   : > { %1456 = shalt.err (!%p1453_p10)
}
  0x82   : > { %s1618_s26 = smov 256   ;;  %s1619_s29 = smov 128  }
  0x83   : > { %s1620_s17 = smov 8   ;;  %p2228_p8 = scmp.ne.s32.totalorder %s2221_s12, 0 }
  0x84   : > { %1166 = dma.hbm_to_vmem [thread:$0]  (!%p2227_p13), %s1885_s16, 2048, %s1911_s0, %s1777_s7, %s1618_s26, %s1619_s29, %s1620_s17  }
  0x85   : > { %268 = sbr.rel (%p2228_p8) target bundleno = 723 (0x2d3), region = 40  ;;  %s270_s5 = sand.u32 (!%p2228_p8), 1, %s1809_s28  }
  0x86   : > { %s272_s2 = sand.u32 (!%p2228_p8), 1, %s1587_s25   ;;  %s271_s14 = scalar_lea.sflag (!%p2228_p8), [#allocation4], %s270_s5 }
  0x87   : > { %s1017_s27 = sshll.u32 (!%p2228_p8), %s272_s2, 6  ;;  %p2229_p2 = scmp.ne.s32.totalorder (!%p2228_p8), %s2214_s9, 0 }
  0x88   : > { %s1943_s13 = scalar_lea.vmem (!%p2228_p8), [#allocation3], %s1017_s27 }
  0x8c   : > { %1542 = dma.done.wait (%p2229_p2), %s271_s14, 1024  }
  0x8d   : > { %1544 = vsyncadd (%p2229_p2), %s271_s14, 4294966272  ;;  %p2230_p0 = scmp.eq.s32.totalorder %s1809_s28, 0 }
  0x8f   : > { %1546 = dma.done.wait (%p2230_p0), [#allocation7], 1024   ;;  %p2231_p13 = pmov %p2230_p0 }
  0x90   : > { %s285_s0 = sand.u32 1, %s1575_s22   ;;  %p2232_p7 = scmp.ne.s32.totalorder %s2218_s24, 0 }
  0x91   : > { %1548 = vsyncadd (%p2231_p13), [#allocation7], 4294966272  ;;  %s1019_s16 = sshll.u32 %s285_s0, 7 }
  0x92   : > { %s1954_s7 = scalar_lea.vmem [#allocation8], %s1019_s16 }
  0x93   : > { %1550 = dma.done.wait (%p2232_p7), %s271_s14, 2048  }
  0x94   : > { %1552 = vsyncadd (%p2232_p7), %s271_s14, 4294965248  ;;  %s2233_s9 = sld [smem:[#allocation16_spill]]  ;;  %s320_s12 = sand.u32 1, %s1563_s19  }
  0x95   : > { %s1020_s28 = sshll.u32 %s320_s12, 8  ;;  %s2234_s30 = sld [smem:[#allocation27_spill]] }
  0x96   : > { %s1974_s24 = scalar_lea.vmem [#allocation9], %s1020_s28 }
  0x9a   : > { %s1962_s4 = sshll.u32 %s2233_s9, 1  ;;  %p1022_p3 = scmp.ne.s32.totalorder %s2233_s9, 0 }
  0x9b   : > { %p326_p1 = scmp.lt.s32.totalorder %s1962_s4, 3  ;;  %v1297_v0 = vld [vmem:[#allocation6] sm:$0xff] (!%p1022_p3)   ;;  %v1298_v1 = vld [vmem:[#allocation6 + $0x8] sm:$0xff] (!%p1022_p3)   ;;  %v1299_v2 = vld [vmem:[#allocation6 + $0x10] sm:$0xff] (!%p1022_p3)   ;;  %s2235_s17 = sld [smem:[#allocation26_spill]] (!%p1022_p3) }
  0x9c   : > { %336 = sbr.rel (%p1022_p3) target bundleno = 432 (0x1b0), region = 56  ;;  %1082 = vmatprep.subr.bf16.mxu0 (!%p1022_p3), %v1297_v0  ;;  %1114 = vmatprep.subr.bf16.mxu1 (!%p1022_p3), %v1297_v0  ;;  %v1300_v3 = vld [vmem:[#allocation6 + $0x18] sm:$0xff] (!%p1022_p3)   ;;  %v1305_v4 = vld [vmem:[%s1943_s13] sm:$0xff] (!%p1022_p3)   ;;  %v1302_v7 = vld [vmem:[#allocation6 + $0x28] sm:$0xff] (!%p1022_p3)  }
  0x9d   : > { %s1968_s8 = scalar_select %p326_p1, %s1962_s4, 3 }
  0x9e   : > { %1083 = vmatpush3.bf16.msra.mxu0 (!%p1022_p3), %v1297_v0  ;;  %1122 = vmatpush3.bf16.msra.mxu1 (!%p1022_p3), %v1297_v0  ;;  %v1306_v5 = vld [vmem:[%s1943_s13 + $0x20] sm:$0xff] (!%p1022_p3)   ;;  %v1303_v8 = vld [vmem:[#allocation6 + $0x30] sm:$0xff] (!%p1022_p3)   ;;  %v1304_v9 = vld [vmem:[#allocation6 + $0x38] sm:$0xff] (!%p1022_p3)  }
  0x9f   : > { %s328_s23 = scalar_lea.vmem %s2234_s30, %s1968_s8  ;;  %1084 = vmatprep.subr.bf16.mxu0 (!%p1022_p3), %v1298_v1  ;;  %1115 = vmatprep.subr.bf16.mxu1 (!%p1022_p3), %v1298_v1  ;;  %v1301_v6 = vld [vmem:[#allocation6 + $0x20] sm:$0xff] (!%p1022_p3)   ;;  %v1307_v10 = vld [vmem:[%s1943_s13 + $0x8] sm:$0xff] (!%p1022_p3)   ;;  %v1309_v12 = vld [vmem:[%s1943_s13 + $0x10] sm:$0xff] (!%p1022_p3)  }
  0xa0   : > { %1098 = vmatprep.mubr.bf16.mxu0 (!%p1022_p3), %v1305_v4  ;;  %1106 = vmatprep.mubr.bf16.mxu1 (!%p1022_p3), %v1306_v5  ;;  %v1308_v11 = vld [vmem:[%s1943_s13 + $0x28] sm:$0xff] (!%p1022_p3)   ;;  %v1310_v13 = vld [vmem:[%s1943_s13 + $0x30] sm:$0xff] (!%p1022_p3)   ;;  %v1311_v14 = vld [vmem:[%s1943_s13 + $0x18] sm:$0xff] (!%p1022_p3)  }
  0xa1   : > { %v1312_v15 = vld [vmem:[%s1943_s13 + $0x38] sm:$0xff] (!%p1022_p3)   ;;  %v1023_v16 = vld [vmem:[%s2235_s17] ss:$0 sm:$0xff] (!%p1022_p3) }
  0xa2   : > { %1085 = vmatpush3.bf16.msra.mxu0 (!%p1022_p3), %v1298_v1  ;;  %1123 = vmatpush3.bf16.msra.mxu1 (!%p1022_p3), %v1298_v1 }
  0xa3   : > { %1086 = vmatprep.subr.bf16.mxu0 %v1299_v2  ;;  %1116 = vmatprep.subr.bf16.mxu1 %v1299_v2 }
  0xa6   : > { %1087 = vmatpush3.bf16.msra.mxu0 %v1299_v2  ;;  %1124 = vmatpush3.bf16.msra.mxu1 %v1299_v2 }
  0xa7   : > { %1088 = vmatprep.subr.bf16.mxu0 %v1300_v3  ;;  %1117 = vmatprep.subr.bf16.mxu1 %v1300_v3 }
  0xaa   : > { %1089 = vmatpush3.bf16.msra.mxu0 %v1300_v3  ;;  %1125 = vmatpush3.bf16.msra.mxu1 %v1300_v3 }
  0xab   : > { %1090 = vmatprep.subr.bf16.mxu0 %v1301_v6  ;;  %1118 = vmatprep.subr.bf16.mxu1 %v1301_v6 }
  0xae   : > { %1091 = vmatpush3.bf16.msra.mxu0 %v1301_v6  ;;  %1126 = vmatpush3.bf16.msra.mxu1 %v1301_v6 }
  0xaf   : > { %1092 = vmatprep.subr.bf16.mxu0 %v1302_v7  ;;  %1119 = vmatprep.subr.bf16.mxu1 %v1302_v7 }
  0xb2   : > { %1093 = vmatpush3.bf16.msra.mxu0 %v1302_v7  ;;  %1127 = vmatpush3.bf16.msra.mxu1 %v1302_v7 }
  0xb3   : > { %1094 = vmatprep.subr.bf16.mxu0 %v1303_v8  ;;  %1120 = vmatprep.subr.bf16.mxu1 %v1303_v8 }
  0xb6   : > { %1095 = vmatpush3.bf16.msra.mxu0 %v1303_v8  ;;  %1128 = vmatpush3.bf16.msra.mxu1 %v1303_v8 }
  0xb7   : > { %1096 = vmatprep.subr.bf16.mxu0 %v1304_v9  ;;  %1121 = vmatprep.subr.bf16.mxu1 %v1304_v9 }
  0xba   : > { %1097 = vmatpush3.bf16.msra.mxu0 %v1304_v9  ;;  %1129 = vmatpush3.bf16.msra.mxu1 %v1304_v9 }
  0xbd   : > { %1099 = vmatmul.mubr.bf16.vlgmr.msra.gmra.mrb[0].mxu0 %v1307_v10  ;;  %1107 = vmatmul.mubr.bf16.vlgmr.msra.gmra.mrb[0].mxu1 %v1308_v11 }
  0xbe   : > { %1102 = vmatprep.mubr.bf16.mxu0 %v1309_v12  ;;  %1110 = vmatprep.mubr.bf16.mxu1 %v1310_v13 }
  0xc5   : > { %1103 = vmatmul.mubr.bf16.gmra.mrb[4].mxu0 %v1311_v14  ;;  %1111 = vmatmul.mubr.bf16.gmra.mrb[4].mxu1 %v1312_v15 }
 0x190   : > { %v1100_v17 = vpop.f32.mrb[0].mxu0  ;;  %v1108_v18 = vpop.f32.mrb[0].mxu1 }
 0x191   : > { %v515_v19 = vadd.f32 %v1100_v17, %v1023_v16  ;;  %v547_v20 = vadd.f32 %v1108_v18, %v1023_v16  ;;  %v506_v21 = vpop.f32.mrb[1].mxu0  ;;  %v538_v22 = vpop.f32.mrb[1].mxu1 }
 0x192   : > { %v507_v23 = vadd.f32 %v1023_v16, %v506_v21  ;;  %v539_v24 = vadd.f32 %v1023_v16, %v538_v22  ;;  %v1101_v25 = vpop.f32.mrb[2].mxu0  ;;  %v1109_v26 = vpop.f32.mrb[2].mxu1 }
 0x193   : > { %1313 = vtanh.f32 %v515_v19  ;;  %v518_v27 = vadd.f32 %v1101_v25, %v1023_v16  ;;  %v509_v28 = vpop.f32.mrb[3].mxu0  ;;  %v541_v29 = vpop.f32.mrb[3].mxu1  ;;  %v550_v30 = vadd.f32 %v1109_v26, %v1023_v16 }
 0x194   : > { %1315 = vtanh.f32 %v547_v20  ;;  %v510_v31 = vadd.f32 %v1023_v16, %v509_v28  ;;  %v542_v32 = vadd.f32 %v1023_v16, %v541_v29 }
 0x195   : > { %1317 = vtanh.f32 %v507_v23 }
 0x196   : > { %1319 = vtanh.f32 %v539_v24 }
 0x197   : > { %1321 = vtanh.f32 %v518_v27 }
 0x198   : > { %1323 = vtanh.f32 %v550_v30  ;;  %v1104_v33 = vpop.f32.mrb[4].mxu0  ;;  %v1112_v34 = vpop.f32.mrb[4].mxu1 }
 0x199   : > { %1325 = vtanh.f32 %v510_v31  ;;  %v531_v35 = vadd.f32 %v1104_v33, %v1023_v16  ;;  %v563_v36 = vadd.f32 %v1112_v34, %v1023_v16  ;;  %v522_v37 = vpop.f32.mrb[5].mxu0  ;;  %v554_v38 = vpop.f32.mrb[5].mxu1 }
 0x19a   : > { %1327 = vtanh.f32 %v542_v32  ;;  %v523_v39 = vadd.f32 %v1023_v16, %v522_v37  ;;  %v555_v40 = vadd.f32 %v1023_v16, %v554_v38  ;;  %v1105_v41 = vpop.f32.mrb[6].mxu0  ;;  %v1113_v42 = vpop.f32.mrb[6].mxu1 }
 0x19b   : > { %1329 = vtanh.f32 %v531_v35  ;;  %v534_v43 = vadd.f32 %v1105_v41, %v1023_v16  ;;  %v525_v44 = vpop.f32.mrb[7].mxu0  ;;  %v557_v45 = vpop.f32.mrb[7].mxu1  ;;  %v566_v46 = vadd.f32 %v1113_v42, %v1023_v16 }
 0x19c   : > { %1331 = vtanh.f32 %v563_v36  ;;  %v526_v48 = vadd.f32 %v1023_v16, %v525_v44  ;;  %v558_v50 = vadd.f32 %v1023_v16, %v557_v45 }
 0x19d   : > { %v1314_v47 = vpop.eup %1313  ;;  %1333 = vtanh.f32 %v523_v39 }
 0x19e   : > { %v1316_v49 = vpop.eup %1315  ;;  %1335 = vtanh.f32 %v555_v40 }
 0x19f   : > { %v1318_v51 = vpop.eup %1317  ;;  %1337 = vtanh.f32 %v534_v43 }
 0x1a0   : > { %v1320_v52 = vpop.eup %1319  ;;  %1339 = vtanh.f32 %v566_v46 }
 0x1a1   : > { %v1322_v53 = vpop.eup %1321  ;;  %1341 = vtanh.f32 %v526_v48 }
 0x1a2   : > { %v1324_v54 = vpop.eup %1323  ;;  %v586_v55 = vpack.c.bf16 %v1322_v53, %v1314_v47  ;;  %1343 = vtanh.f32 %v558_v50 }
 0x1a3   : > { %v1326_v56 = vpop.eup %1325  ;;  %v590_v57 = vpack.c.bf16 %v1324_v54, %v1316_v49 }
 0x1a4   : > { %v1328_v58 = vpop.eup %1327  ;;  %594 = vst [vmem:[#allocation2 + $0x8] sm:$0xff] %v586_v55  ;;  %v585_v59 = vpack.c.bf16 %v1326_v56, %v1318_v51 }
 0x1a5   : > { %v1330_v60 = vpop.eup %1329  ;;  %598 = vst [vmem:[#allocation2 + $0x28] sm:$0xff] %v590_v57  ;;  %v589_v61 = vpack.c.bf16 %v1328_v58, %v1320_v52 }
 0x1a6   : > { %v1332_v62 = vpop.eup %1331  ;;  %593 = vst [vmem:[#allocation2] sm:$0xff] %v585_v59 }
 0x1a7   : > { %v1334_v63 = vpop.eup %1333  ;;  %597 = vst [vmem:[#allocation2 + $0x20] sm:$0xff] %v589_v61 }
 0x1a8   : > { %v1336_v0 = vpop.eup %1335 }
 0x1a9   : > { %v1338_v1 = vpop.eup %1337 }
 0x1aa   : > { %v1340_v2 = vpop.eup %1339  ;;  %v588_v3 = vpack.c.bf16 %v1338_v1, %v1330_v60 }
 0x1ab   : > { %v1342_v4 = vpop.eup %1341  ;;  %v592_v5 = vpack.c.bf16 %v1340_v2, %v1332_v62 }
 0x1ac   : > { %v1344_v6 = vpop.eup %1343  ;;  %596 = vst [vmem:[#allocation2 + $0x18] sm:$0xff] %v588_v3  ;;  %v587_v7 = vpack.c.bf16 %v1342_v4, %v1334_v63 }
 0x1ad   : > { %600 = vst [vmem:[#allocation2 + $0x38] sm:$0xff] %v592_v5  ;;  %v591_v8 = vpack.c.bf16 %v1344_v6, %v1336_v0 }
 0x1ae   : > { %595 = vst [vmem:[#allocation2 + $0x10] sm:$0xff] %v587_v7 }
 0x1af   : > { %599 = vst [vmem:[#allocation2 + $0x30] sm:$0xff] %v591_v8 }
 0x1b0 PF: > { %v1345_v9 = vld [vmem:[%s1954_s7 + $0x4] ss:$8 sps:$4 sm:$0xff]   ;;  %v1347_v10 = vld [vmem:[%s1954_s7] ss:$8 sps:$4 sm:$0xff]   ;;  %v1621_v11 = vmov 0   ;;  %v627_v34 = vlaneseq  ;;  %s2237_s14 = sld [smem:[#allocation17_spill]] }
 0x1b1   : > { %749 = vmatprep.mubr.bf16.mxu0 %v1621_v11  ;;  %789 = vmatprep.mubr.bf16.mxu1 %v1621_v11  ;;  %v1348_v12 = vld [vmem:[%s1954_s7 + $0x14] ss:$8 sps:$4 sm:$0xff]   ;;  %v1350_v13 = vld [vmem:[%s1954_s7 + $0x10] ss:$8 sps:$4 sm:$0xff]   ;;  %v1351_v14 = vld [vmem:[%s1954_s7 + $0x24] ss:$8 sps:$4 sm:$0xff]  }
 0x1b2   : > { %717 = vmatprep.subr.bf16.mxu0 %v1345_v9  ;;  %1130 = vmatprep.subr.bf16.mxu1 %v1345_v9  ;;  %v1353_v15 = vld [vmem:[%s1954_s7 + $0x20] ss:$8 sps:$4 sm:$0xff]   ;;  %v1354_v16 = vld [vmem:[%s1954_s7 + $0x34] ss:$8 sps:$4 sm:$0xff]   ;;  %v1356_v17 = vld [vmem:[%s1954_s7 + $0x30] ss:$8 sps:$4 sm:$0xff]  }
 0x1b3   : > { %718 = vmatpush1.bf16.msra.mxu0 %v1347_v10  ;;  %1138 = vmatpush1.bf16.msra.mxu1 %v1347_v10  ;;  %v1357_v18 = vld [vmem:[%s1954_s7 + $0x44] ss:$8 sps:$4 sm:$0xff]   ;;  %v1359_v19 = vld [vmem:[%s1954_s7 + $0x40] ss:$8 sps:$4 sm:$0xff]   ;;  %v1360_v20 = vld [vmem:[%s1954_s7 + $0x54] ss:$8 sps:$4 sm:$0xff]  }
 0x1b4   : > { %719 = vmatprep.subr.bf16.mxu0 %v1348_v12  ;;  %1131 = vmatprep.subr.bf16.mxu1 %v1348_v12  ;;  %v1362_v21 = vld [vmem:[%s1954_s7 + $0x50] ss:$8 sps:$4 sm:$0xff]   ;;  %v1363_v22 = vld [vmem:[%s1954_s7 + $0x64] ss:$8 sps:$4 sm:$0xff]   ;;  %v1365_v23 = vld [vmem:[%s1954_s7 + $0x60] ss:$8 sps:$4 sm:$0xff]  }
 0x1b5   : > { %v1366_v24 = vld [vmem:[%s1954_s7 + $0x74] ss:$8 sps:$4 sm:$0xff]   ;;  %v1368_v25 = vld [vmem:[%s1954_s7 + $0x70] ss:$8 sps:$4 sm:$0xff]   ;;  %v601_v26 = vld [vmem:[#allocation2] sm:$0xff]  ;;  %v628_v35 = vshrl.u32 %v627_v34, 7 }
 0x1b6   : > { %v605_v27 = vld [vmem:[#allocation2 + $0x20] sm:$0xff]  ;;  %v602_v28 = vld [vmem:[#allocation2 + $0x8] sm:$0xff]  ;;  %v603_v30 = vld [vmem:[#allocation2 + $0x10] sm:$0xff]  ;;  %s1065_s13 = sshll.u32 %s2237_s14, 6  ;;  %s879_s7 = sshll.u32 %s1974_s24, 4  ;;  %s2085_s7 = int_to_ptr.vmem [resolvable:$true] %s879_s7 }
 0x1b7   : > { %720 = vmatpush1.bf16.msra.mxu0 %v1350_v13  ;;  %1139 = vmatpush1.bf16.msra.mxu1 %v1350_v13  ;;  %v606_v29 = vld [vmem:[#allocation2 + $0x28] sm:$0xff]  ;;  %v607_v31 = vld [vmem:[#allocation2 + $0x30] sm:$0xff]  ;;  %v604_v32 = vld [vmem:[#allocation2 + $0x18] sm:$0xff]  ;;  %v629_v36 = vsub.s32 0, %v628_v35  ;;  %v633_v38 = vsub.s32 1, %v628_v35  ;;  %s876_s0 = sadd.s32 %s1065_s13, %s1962_s4  ;;  %s2238_s28 = sld [smem:[#allocation28_spill]] }
 0x1b8   : > { %721 = vmatprep.subr.bf16.mxu0 %v1351_v14  ;;  %1132 = vmatprep.subr.bf16.mxu1 %v1351_v14  ;;  %v608_v33 = vld [vmem:[#allocation2 + $0x38] sm:$0xff]  ;;  %v625_v37 = vld [vmem:[%s328_s23] sm:$0x3]  ;;  %s1060_s16 = sshll.u32 %s876_s0, 7  ;;  %s2097_s10 = scalar_lea.sflag [#allocation5], %s320_s12 }
 0x1b9   : > { %v2017_v39 = vrot.slane %v625_v37, %v629_v36  ;;  %v2019_v40 = vrot.slane %v625_v37, %v633_v38  ;;  %s1457_s30 = scalar_lea.vmem %s2085_s7, 4096  ;;  %p2240_p9 = scmp.ne.s32.totalorder %s2219_s21, 0 }
 0x1ba   : > { %p1458_p11 = scmp.ne.s32.totalorder %s2085_s7, %s1457_s30  ;;  %s1622_s23 = smov [#allocation9]  }
 0x1bb   : > { %722 = vmatpush1.bf16.msra.mxu0 %v1353_v15  ;;  %1140 = vmatpush1.bf16.msra.mxu1 %v1353_v15  ;;  %s1461_s26 = sshll.u32 %s1622_s23, 4  ;;  %s1462_s26 = int_to_ptr.vmem [resolvable:$false] %s1461_s26 }
 0x1bc   : > { %723 = vmatprep.subr.bf16.mxu0 %v1354_v16  ;;  %1133 = vmatprep.subr.bf16.mxu1 %v1354_v16  ;;  %p1459_p12 = pnand %p1458_p11, %p2240_p9  ;;  %s1463_s29 = scalar_lea.vmem %s1462_s26, 8192 }
 0x1bd   : > { %s2239_s8 = smov %s2238_s28  ;;  %s2079_s15 = scalar_lea.hbm %s2238_s28, %s1060_s16 }
 0x1be   : > { %p1460_p6 = pneg %p1459_p12  ;;  %p1464_p5 = scmp.lt.s32.totalorder %s2085_s7, %s1462_s26 }
 0x1bf   : > { %724 = vmatpush1.bf16.msra.mxu0 %v1356_v17  ;;  %1141 = vmatpush1.bf16.msra.mxu1 %v1356_v17  ;;  %p1465_p4 = scmp.lt.s32.totalorder %s1463_s29, %s1457_s30 }
 0x1c0   : > { %725 = vmatprep.subr.bf16.mxu0 %v1357_v18  ;;  %1134 = vmatprep.subr.bf16.mxu1 %v1357_v18 }
 0x1c1   : > { %p1466_p10 = por %p1465_p4, %p1464_p5 }
 0x1c3   : > { %726 = vmatpush1.bf16.msra.mxu0 %v1359_v19  ;;  %1142 = vmatpush1.bf16.msra.mxu1 %v1359_v19  ;;  %p1467_p8 = pnand %p1466_p10, %p1460_p6 }
 0x1c4   : > { %727 = vmatprep.subr.bf16.mxu0 %v1360_v20  ;;  %1135 = vmatprep.subr.bf16.mxu1 %v1360_v20 }
 0x1c7   : > { %728 = vmatpush1.bf16.msra.mxu0 %v1362_v21  ;;  %1143 = vmatpush1.bf16.msra.mxu1 %v1362_v21 }
 0x1c8   : > { %729 = vmatprep.subr.bf16.mxu0 %v1363_v22  ;;  %1136 = vmatprep.subr.bf16.mxu1 %v1363_v22 }
 0x1cb   : > { %730 = vmatpush1.bf16.msra.mxu0 %v1365_v23  ;;  %1144 = vmatpush1.bf16.msra.mxu1 %v1365_v23 }
 0x1cc   : > { %731 = vmatprep.subr.bf16.mxu0 %v1366_v24  ;;  %1137 = vmatprep.subr.bf16.mxu1 %v1366_v24 }
 0x1cf   : > { %732 = vmatpush1.bf16.msra.mxu0 %v1368_v25  ;;  %1145 = vmatpush1.bf16.msra.mxu1 %v1368_v25 }
 0x1d2   : > { %750 = vmatmul.mubr.bf16.vlgmr.msra.gmra.mrb[0].mxu0 %v601_v26  ;;  %790 = vmatmul.mubr.bf16.vlgmr.msra.gmra.mrb[0].mxu1 %v605_v27 }
 0x1d3   : > { %759 = vmatprep.mubr.bf16.mxu0 %v1621_v11  ;;  %799 = vmatprep.mubr.bf16.mxu1 %v1621_v11 }
 0x1da   : > { %760 = vmatmul.mubr.bf16.gmra.mrb[4].mxu0 %v602_v28  ;;  %800 = vmatmul.mubr.bf16.gmra.mrb[4].mxu1 %v606_v29 }
 0x1db   : > { %769 = vmatprep.mubr.bf16.mxu0 %v1621_v11  ;;  %809 = vmatprep.mubr.bf16.mxu1 %v1621_v11 }
 0x1e2   : > { %770 = vmatmul.mubr.bf16.gmra.mrb[8].mxu0 %v603_v30  ;;  %810 = vmatmul.mubr.bf16.gmra.mrb[8].mxu1 %v607_v31 }
 0x1e3   : > { %779 = vmatprep.mubr.bf16.mxu0 %v1621_v11  ;;  %819 = vmatprep.mubr.bf16.mxu1 %v1621_v11 }
 0x1ea   : > { %780 = vmatmul.mubr.bf16.gmra.mrb[12].mxu0 %v604_v32  ;;  %820 = vmatmul.mubr.bf16.gmra.mrb[12].mxu1 %v608_v33 }
 0x2a5   : > { %v751_v41 = vpop.f32.mrb[0].mxu0  ;;  %v791_v42 = vpop.f32.mrb[0].mxu1 }
 0x2a6   : > { %v752_v43 = vadd.f32 %v751_v41, %v2017_v39  ;;  %v792_v44 = vadd.f32 %v791_v42, %v2017_v39  ;;  %v753_v45 = vpop.f32.mrb[1].mxu0  ;;  %v793_v46 = vpop.f32.mrb[1].mxu1 }
 0x2a7   : > { %v754_v47 = vadd.f32 %v753_v45, %v2019_v40  ;;  %v794_v48 = vadd.f32 %v793_v46, %v2019_v40  ;;  %v755_v49 = vpop.f32.mrb[2].mxu0  ;;  %v795_v50 = vpop.f32.mrb[2].mxu1 }
 0x2a8   : > { %830 = vst [vmem:[%s1974_s24] sm:$0xff] %v752_v43  ;;  %846 = vst [vmem:[%s1974_s24 + $0x80] sm:$0xff] %v792_v44  ;;  %v756_v51 = vadd.f32 %v755_v49, %v2017_v39  ;;  %v796_v52 = vadd.f32 %v795_v50, %v2017_v39  ;;  %v757_v53 = vpop.f32.mrb[3].mxu0  ;;  %v797_v54 = vpop.f32.mrb[3].mxu1 }
 0x2a9   : > { %831 = vst [vmem:[%s1974_s24 + $0x8] sm:$0xff] %v754_v47  ;;  %847 = vst [vmem:[%s1974_s24 + $0x88] sm:$0xff] %v794_v48  ;;  %v758_v55 = vadd.f32 %v757_v53, %v2019_v40  ;;  %v798_v56 = vadd.f32 %v797_v54, %v2019_v40 }
 0x2aa   : > { %832 = vst [vmem:[%s1974_s24 + $0x10] sm:$0xff] %v756_v51  ;;  %848 = vst [vmem:[%s1974_s24 + $0x90] sm:$0xff] %v796_v52 }
 0x2ab   : > { %833 = vst [vmem:[%s1974_s24 + $0x18] sm:$0xff] %v758_v55  ;;  %849 = vst [vmem:[%s1974_s24 + $0x98] sm:$0xff] %v798_v56 }
 0x2ad   : > { %v761_v57 = vpop.f32.mrb[4].mxu0  ;;  %v801_v58 = vpop.f32.mrb[4].mxu1 }
 0x2ae   : > { %v762_v59 = vadd.f32 %v761_v57, %v2017_v39  ;;  %v802_v60 = vadd.f32 %v801_v58, %v2017_v39  ;;  %v763_v61 = vpop.f32.mrb[5].mxu0  ;;  %v803_v62 = vpop.f32.mrb[5].mxu1 }
 0x2af   : > { %v764_v63 = vadd.f32 %v763_v61, %v2019_v40  ;;  %v804_v0 = vadd.f32 %v803_v62, %v2019_v40  ;;  %v765_v1 = vpop.f32.mrb[6].mxu0  ;;  %v805_v2 = vpop.f32.mrb[6].mxu1 }
 0x2b0   : > { %834 = vst [vmem:[%s1974_s24 + $0x20] sm:$0xff] %v762_v59  ;;  %850 = vst [vmem:[%s1974_s24 + $0xa0] sm:$0xff] %v802_v60  ;;  %v766_v3 = vadd.f32 %v765_v1, %v2017_v39  ;;  %v806_v4 = vadd.f32 %v805_v2, %v2017_v39  ;;  %v767_v5 = vpop.f32.mrb[7].mxu0  ;;  %v807_v6 = vpop.f32.mrb[7].mxu1 }
 0x2b1   : > { %835 = vst [vmem:[%s1974_s24 + $0x28] sm:$0xff] %v764_v63  ;;  %851 = vst [vmem:[%s1974_s24 + $0xa8] sm:$0xff] %v804_v0  ;;  %v768_v7 = vadd.f32 %v767_v5, %v2019_v40  ;;  %v808_v8 = vadd.f32 %v807_v6, %v2019_v40 }
 0x2b2   : > { %836 = vst [vmem:[%s1974_s24 + $0x30] sm:$0xff] %v766_v3  ;;  %852 = vst [vmem:[%s1974_s24 + $0xb0] sm:$0xff] %v806_v4 }
 0x2b3   : > { %837 = vst [vmem:[%s1974_s24 + $0x38] sm:$0xff] %v768_v7  ;;  %853 = vst [vmem:[%s1974_s24 + $0xb8] sm:$0xff] %v808_v8 }
 0x2b5   : > { %v771_v9 = vpop.f32.mrb[8].mxu0  ;;  %v811_v10 = vpop.f32.mrb[8].mxu1 }
 0x2b6   : > { %v772_v11 = vadd.f32 %v771_v9, %v2017_v39  ;;  %v812_v12 = vadd.f32 %v811_v10, %v2017_v39  ;;  %v773_v13 = vpop.f32.mrb[9].mxu0  ;;  %v813_v14 = vpop.f32.mrb[9].mxu1 }
 0x2b7   : > { %v774_v15 = vadd.f32 %v773_v13, %v2019_v40  ;;  %v814_v16 = vadd.f32 %v813_v14, %v2019_v40  ;;  %v775_v17 = vpop.f32.mrb[10].mxu0  ;;  %v815_v18 = vpop.f32.mrb[10].mxu1 }
 0x2b8   : > { %838 = vst [vmem:[%s1974_s24 + $0x40] sm:$0xff] %v772_v11  ;;  %854 = vst [vmem:[%s1974_s24 + $0xc0] sm:$0xff] %v812_v12  ;;  %v776_v19 = vadd.f32 %v775_v17, %v2017_v39  ;;  %v816_v20 = vadd.f32 %v815_v18, %v2017_v39  ;;  %v777_v21 = vpop.f32.mrb[11].mxu0  ;;  %v817_v22 = vpop.f32.mrb[11].mxu1 }
 0x2b9   : > { %839 = vst [vmem:[%s1974_s24 + $0x48] sm:$0xff] %v774_v15  ;;  %855 = vst [vmem:[%s1974_s24 + $0xc8] sm:$0xff] %v814_v16  ;;  %v778_v23 = vadd.f32 %v777_v21, %v2019_v40  ;;  %v818_v24 = vadd.f32 %v817_v22, %v2019_v40 }
 0x2ba   : > { %840 = vst [vmem:[%s1974_s24 + $0x50] sm:$0xff] %v776_v19  ;;  %856 = vst [vmem:[%s1974_s24 + $0xd0] sm:$0xff] %v816_v20 }
 0x2bb   : > { %841 = vst [vmem:[%s1974_s24 + $0x58] sm:$0xff] %v778_v23  ;;  %857 = vst [vmem:[%s1974_s24 + $0xd8] sm:$0xff] %v818_v24 }
 0x2bd   : > { %v781_v25 = vpop.f32.mrb[12].mxu0  ;;  %v821_v26 = vpop.f32.mrb[12].mxu1 }
 0x2be   : > { %v782_v27 = vadd.f32 %v781_v25, %v2017_v39  ;;  %v822_v28 = vadd.f32 %v821_v26, %v2017_v39  ;;  %v783_v29 = vpop.f32.mrb[13].mxu0  ;;  %v823_v30 = vpop.f32.mrb[13].mxu1 }
 0x2bf   : > { %v784_v31 = vadd.f32 %v783_v29, %v2019_v40  ;;  %v824_v32 = vadd.f32 %v823_v30, %v2019_v40  ;;  %v785_v33 = vpop.f32.mrb[14].mxu0  ;;  %v825_v34 = vpop.f32.mrb[14].mxu1 }
 0x2c0   : > { %842 = vst [vmem:[%s1974_s24 + $0x60] sm:$0xff] %v782_v27  ;;  %858 = vst [vmem:[%s1974_s24 + $0xe0] sm:$0xff] %v822_v28  ;;  %v786_v35 = vadd.f32 %v785_v33, %v2017_v39  ;;  %v826_v36 = vadd.f32 %v825_v34, %v2017_v39  ;;  %v787_v37 = vpop.f32.mrb[15].mxu0  ;;  %v827_v38 = vpop.f32.mrb[15].mxu1 }
 0x2c1   : > { %843 = vst [vmem:[%s1974_s24 + $0x68] sm:$0xff] %v784_v31  ;;  %859 = vst [vmem:[%s1974_s24 + $0xe8] sm:$0xff] %v824_v32  ;;  %v788_v41 = vadd.f32 %v787_v37, %v2019_v40  ;;  %v828_v42 = vadd.f32 %v827_v38, %v2019_v40 }
 0x2c2   : > { %844 = vst [vmem:[%s1974_s24 + $0x70] sm:$0xff] %v786_v35  ;;  %860 = vst [vmem:[%s1974_s24 + $0xf0] sm:$0xff] %v826_v36 }
 0x2c3   : > { %845 = vst [vmem:[%s1974_s24 + $0x78] sm:$0xff] %v788_v41  ;;  %861 = vst [vmem:[%s1974_s24 + $0xf8] sm:$0xff] %v828_v42 }
 0x2c4   : > { %1470 = shalt.err (!%p1467_p8)
}
 0x2c5   : > { %s1471_s12 = scalar_lea.hbm %s2079_s15, 4096  ;;  %s1475_s5 = scalar_lea.hbm %s2239_s8, 16384 }
 0x2c6   : > { %p1472_p2 = scmp.ne.s32.totalorder %s2079_s15, %s1471_s12  ;;  %p1476_p7 = scmp.lt.u32.totalorder %s2079_s15, %s2239_s8 }
 0x2c7   : > { %p1477_p1 = scmp.lt.u32.totalorder %s1475_s5, %s1471_s12  ;;  %p1479_p11 = scmp.lt.u32.totalorder %s1471_s12, %s2079_s15 }
 0x2c8   : > { %p1473_p0 = pnand %p1472_p2, %p2240_p9 }
 0x2c9   : > { %p1478_p3 = por %p1477_p1, %p1476_p7 }
 0x2ca   : > { %p1474_p13 = pneg %p1473_p0 }
 0x2cb   : > { %p1480_p12 = por %p1479_p11, %p1478_p3 }
 0x2cd   : > { %p1481_p6 = pnand %p1480_p12, %p1474_p13 }
 0x2cf   : > { %1484 = shalt.err (!%p1481_p6)
}
 0x2d0   : > { %s1623_s14 = smov 256   ;;  %s1624_s13 = smov 512  }
 0x2d1   : > { %s1625_s0 = smov 16  }
 0x2d2   : > { %1154 = dma.vmem_to_hbm [thread:$0]  (%p2240_p9), %s2085_s7, 4096, %s2079_s15, %s2097_s10, %s1623_s14, %s1624_s13, %s1625_s0  }
 0x2d3 PF: > { %p1174_p5 = scmp.ge.s32.totalorder %s1611_s6, 2  ;;  %s894_s16 = sand.u32 1, %s1559_s18  }
 0x2d4   : > { %p2241_p4 = scmp.ne.s32.totalorder %s2220_s11, 0  ;;  %s895_s9 = scalar_lea.sflag [#allocation5], %s894_s16 }
 0x2d6   : > { %p1168_p10 = pnand %p1174_p5, %p2241_p4 }
 0x2d8   : > { %1554 = dma.done.wait (!%p1168_p10), %s895_s9, 4096  }
 0x2d9   : > { %1556 = vsyncadd (!%p1168_p10), %s895_s9, 4294963200  ;;  %s22_s6 = sadd.s32 1, %s1611_s6   ;;  %s2243_s21 = sld [smem:[#allocation23_spill]] }
 0x2da   : > { %p2126_p8 = scmp.ge.s32.totalorder %s22_s6, 6   ;;  %s2244_s7 = sld [smem:[#allocation14_spill]] }
 0x2db   : > { %s2245_s23 = sld [smem:[#allocation24_spill]]  ;;  %s2246_s28 = sld [smem:[#allocation15_spill]] }
 0x2dc   : > { %s2247_s26 = sld [smem:[#allocation22_spill]]  ;;  %s2248_s27 = sld [smem:[#allocation18_spill]] }
 0x2dd   : > { %s2249_s11 = sld [smem:[#allocation19_spill]]  ;;  %s2250_s29 = sld [smem:[#allocation20_spill]] }
 0x2de   : > { %s2251_s30 = sld [smem:[#allocation21_spill]]  ;;  %s2252_s18 = smov %s1563_s19 }
 0x2df   : > { %s2253_s19 = smov %s1567_s20  ;;  %s2254_s20 = smov %s2243_s21 }
 0x2e0   : > { %s2255_s21 = smov %s1575_s22  ;;  %s2256_s22 = smov %s2244_s7 }
 0x2e1   : > { %s2257_s24 = smov %s1587_s25  ;;  %s2258_s25 = smov %s2246_s28 }
 0x2e2   :  { %21 = sbr.rel (!%p2126_p8) target bundleno = 16 (0x10), region = 107 }
 0x2e3   : > { %s2259_s28 = smov %s2249_s11 }
 0x2e9   :  { %900 = vsyncpa [#allocation4], 1 }
 0x2ea   :  { %902 = vsyncpa [#allocation4 + $0x1], 1 }
 0x2eb   :  { %903 = vsyncpa [#allocation7], 1 }
 0x2ec   :  { %904 = vsyncpa [#allocation5], 1 }
 0x2ed   :  { %906 = vsyncpa [#allocation5 + $0x1], 1 }

</bundles_post_ra>
